<compile_context>
chip_gen: v5e
topology: v5e:2x2
jax: 0.10.0
libtpu: 0.0.40
codegen_flags: <defaults>
</compile_context>

<pallas_src>
import functools

import jax
import jax.numpy as jnp
from jax.experimental import pallas as pl
from jax.experimental.pallas import tpu as pltpu


_LANE = 128
_SCOPED_VMEM_DEFAULT = 32 << 20      # v6e / v7x scoped-VMEM default
_VMEM_SAFE_CAP = 48 << 20            # stay under v7x's 64 MiB physical VMEM


# ---------------------------------------------------------------------------
# Kernel bodies
# ---------------------------------------------------------------------------

def _sigmoid(h):
    # sigmoid(h) == 0.5*(tanh(0.5*h)+1): a single EUP push per element
    # (vs exp + reciprocal/divide), the mul/add go to the VALU which has slack.
    return 0.5 * (jnp.tanh(0.5 * h) + 1.0)


def _mlp_body(x, w1, b1, w2, b2, w3, b3):
    """Shared forward math, batch on the lane axis.

    x : (2, TB) f32    w1: (H, 2) f32           b1: (H, 1) f32
    w2: (H, H) mxu_dtype                        b2: (H, 1) f32
    w3: (3, H) mxu_dtype                        b3: (3, 1) f32
    returns logits (3, TB) f32
    """
    # Layer 1: contraction length is 2 -> two broadcast FMAs on the VPU,
    # skipping a >98%-padded (and serialized) MXU pass.
    h1 = w1[:, 0:1] * x[0:1, :] + w1[:, 1:2] * x[1:2, :] + b1
    h1 = _sigmoid(h1)                                            # (H, TB) f32

    # Layers 2 & 3 on the MXU with f32 accumulation (operand dtype = weights').
    h2 = jnp.dot(w2, h1.astype(w2.dtype),
                 preferred_element_type=jnp.float32) + b2
    h2 = _sigmoid(h2)                                            # (H, TB) f32

    return jnp.dot(w3, h2.astype(w3.dtype),
                   preferred_element_type=jnp.float32) + b3      # (3, TB) f32


def winenet_fwd_kernel(x_ref, w1_ref, b1_ref, w2_ref, b2_ref, w3_ref, b3_ref,
                       o_ref):
    logits = _mlp_body(x_ref[...], w1_ref[...], b1_ref[...], w2_ref[...],
                       b2_ref[...], w3_ref[...], b3_ref[...])
    o_ref[...] = logits.astype(o_ref.dtype)


def winenet_pred_kernel(x_ref, w1_ref, b1_ref, w2_ref, b2_ref, w3_ref, b3_ref,
                        pred_ref):
    logits = _mlp_body(x_ref[...], w1_ref[...], b1_ref[...], w2_ref[...],
                       b2_ref[...], w3_ref[...], b3_ref[...])
    # Fused argmax over the 3 classes (first max wins, matching torch/jnp).
    l0, l1, l2 = logits[0:1, :], logits[1:2, :], logits[2:3, :]
    pred = jnp.where(l1 > l0, 1, 0)
    pred = jnp.where(l2 > jnp.maximum(l0, l1), 2, pred)
    pred_ref[...] = pred.astype(pred_ref.dtype)     # int8: 1 B/elem writeback


# ---------------------------------------------------------------------------
# Tiling / spec construction
# ---------------------------------------------------------------------------

def _tile_and_pad(B, H, block_b):
    """Pick the batch tile TB (lane multiple), keep >= 2 grid steps when the
    batch allows it (v7x 2-TC sharding), clamp to a v7x-safe VMEM budget."""
    block_b = max(_LANE, (int(block_b) // _LANE) * _LANE)
    B128 = pl.cdiv(B, _LANE) * _LANE

    # Bytes per unit of TB: double-buffered (2,TB)+(3,TB) f32 I/O tiles plus
    # ~3 (H,TB) f32 intermediates.  Clamp TB so the budget stays v7x-safe.
    per_tb_bytes = (2 * (2 + 3) + 3 * H) * 4
    max_tb = max(_LANE, (_VMEM_SAFE_CAP // per_tb_bytes) // _LANE * _LANE)

    TB = min(block_b, B128, max_tb)
    # Ensure >= 2 grid steps when possible so v7x's second TensorCore has
    # work; no-op on single-TC v5e/v6e.
    if B128 >= 2 * _LANE and pl.cdiv(B128, TB) < 2:
        TB = pl.cdiv(B128 // 2, _LANE) * _LANE
    B_pad = pl.cdiv(B, TB) * TB
    return TB, B_pad


def _prep_t(xT, params, block_b, mxu_dtype):
    """xT: (2, B). Builds args/specs/grid shared by forward and inference."""
    assert xT.ndim == 2 and xT.shape[0] == 2, "expected (2, B) input"
    B = xT.shape[1]
    H = params["w1"].shape[0]
    TB, B_pad = _tile_and_pad(B, H, block_b)

    xT = xT.astype(jnp.float32)
    if B_pad != B:                       # skip the pad pass when already aligned
        xT = jnp.pad(xT, ((0, 0), (0, B_pad - B)))

    w1 = params["w1"].astype(jnp.float32)                     # (H, 2)  VPU layer
    b1 = params["b1"].reshape(H, 1).astype(jnp.float32)
    w2 = params["w2"].astype(mxu_dtype)                       # (H, H)  MXU
    b2 = params["b2"].reshape(H, 1).astype(jnp.float32)
    w3 = params["w3"].astype(mxu_dtype)                       # (3, H)  MXU
    b3 = params["b3"].reshape(3, 1).astype(jnp.float32)

    in_specs = [
        pl.BlockSpec((2, TB), lambda i: (0, i)),   # x tile: batch on lanes
        pl.BlockSpec((H, 2), lambda i: (0, 0)),    # weights/biases stay
        pl.BlockSpec((H, 1), lambda i: (0, 0)),    # VMEM-resident across steps
        pl.BlockSpec((H, H), lambda i: (0, 0)),
        pl.BlockSpec((H, 1), lambda i: (0, 0)),
        pl.BlockSpec((3, H), lambda i: (0, 0)),
        pl.BlockSpec((3, 1), lambda i: (0, 0)),
    ]
    args = (xT, w1, b1, w2, b2, w3, b3)
    grid = (B_pad // TB,)

    # Raise the scoped-VMEM limit only when the computed budget needs it
    # (only reachable with very large block_b).
    budget = (2 * (2 + 3) * TB + 3 * H * TB
              + 2 * H + H + H * H + H + 3 * H + 3) * 4
    cp_kwargs = dict(dimension_semantics=("parallel",))
    if budget > _SCOPED_VMEM_DEFAULT // 2:
        cp_kwargs["vmem_limit_bytes"] = min(_VMEM_SAFE_CAP, 2 * budget)
    compiler_params = pltpu.CompilerParams(**cp_kwargs)

    return args, in_specs, grid, TB, B_pad, B, compiler_params


# ---------------------------------------------------------------------------
# Public wrappers
# ---------------------------------------------------------------------------

@functools.partial(jax.jit, static_argnames=("block_b", "mxu_dtype"))
def winenet_forward_t(xT, params, *, block_b=2048, mxu_dtype=jnp.float32):
    """Transposed-layout entry point: xT (2, B) f32 -> logits (3, B) f32.
    No wrapper transposes; no pad pass when B is a tile multiple."""
    args, in_specs, grid, TB, B_pad, B, cp = _prep_t(xT, params, block_b,
                                                     mxu_dtype)
    out_t = pl.pallas_call(
        winenet_fwd_kernel,
        out_shape=jax.ShapeDtypeStruct((3, B_pad), jnp.float32),
        grid=grid,
        in_specs=in_specs,
        out_specs=pl.BlockSpec((3, TB), lambda i: (0, i)),
        compiler_params=cp,
    )(*args)
    return out_t[:, :B] if B_pad != B else out_t


@functools.partial(jax.jit, static_argnames=("block_b", "mxu_dtype"))
def winenet_inference_t(xT, params, *, block_b=2048, mxu_dtype=jnp.float32):
    """Transposed-layout inference: xT (2, B) -> predictions (B,) int32."""
    args, in_specs, grid, TB, B_pad, B, cp = _prep_t(xT, params, block_b,
                                                     mxu_dtype)
    pred = pl.pallas_call(
        winenet_pred_kernel,
        out_shape=jax.ShapeDtypeStruct((1, B_pad), jnp.int8),
        grid=grid,
        in_specs=in_specs,
        out_specs=pl.BlockSpec((1, TB), lambda i: (0, i)),
        compiler_params=cp,
    )(*args)
    return pred[0, :B].astype(jnp.int32)


@functools.partial(jax.jit, static_argnames=("block_b", "mxu_dtype"))
def winenet_forward(x, params, *, block_b=2048, mxu_dtype=jnp.float32):
    """PyTorch layout: x (B, 2) f32 -> logits (B, 3) f32."""
    return winenet_forward_t(x.T, params, block_b=block_b,
                             mxu_dtype=mxu_dtype).T


@functools.partial(jax.jit, static_argnames=("block_b", "mxu_dtype"))
def winenet_inference(x, params, *, block_b=2048, mxu_dtype=jnp.float32):
    """Equivalent of WineNet.inference: x (B, 2) -> (B,) int32 class ids."""
    return winenet_inference_t(x.T, params, block_b=block_b,
                               mxu_dtype=mxu_dtype)


# ---------------------------------------------------------------------------
# Params / reference
# ---------------------------------------------------------------------------

def init_params(key, n_hidden_neurons):
    """PyTorch-style Linear init: U(-1/sqrt(fan_in), 1/sqrt(fan_in)),
    weights stored (out, in) exactly like nn.Linear."""
    def linear(k, fan_in, fan_out):
        kw, kb = jax.random.split(k)
        bound = 1.0 / jnp.sqrt(fan_in)
        w = jax.random.uniform(kw, (fan_out, fan_in), jnp.float32, -bound, bound)
        b = jax.random.uniform(kb, (fan_out,), jnp.float32, -bound, bound)
        return w, b

    k1, k2, k3 = jax.random.split(key, 3)
    w1, b1 = linear(k1, 2, n_hidden_neurons)
    w2, b2 = linear(k2, n_hidden_neurons, n_hidden_neurons)
    w3, b3 = linear(k3, n_hidden_neurons, 3)
    return dict(w1=w1, b1=b1, w2=w2, b2=b2, w3=w3, b3=b3)


def ref_forward(x, p):
    """Pure-JAX float32 reference matching the PyTorch module."""
    h1 = jax.nn.sigmoid(x @ p["w1"].T + p["b1"])
    h2 = jax.nn.sigmoid(h1 @ p["w2"].T + p["b2"])
    return h2 @ p["w3"].T + p["b3"]


# ---------------------------------------------------------------------------
# Self-test
# ---------------------------------------------------------------------------

if __name__ == "__main__":
    key = jax.random.PRNGKey(0)
    k_params, k_x1, k_x2 = jax.random.split(key, 3)

    n_hidden = 32
    params = init_params(k_params, n_hidden)

    # Small batch: single-tile path with lane padding.
    x_small = jax.random.normal(k_x1, (8, 2), jnp.float32)
    logits = jax.block_until_ready(winenet_forward(x_small, params))
    assert logits.shape == (8, 3) and logits.dtype == jnp.float32
    assert jnp.allclose(logits, ref_forward(x_small, params),
                        atol=1e-4, rtol=1e-4)

    preds = jax.block_until_ready(winenet_inference(x_small, params))
    assert preds.shape == (8,) and preds.dtype == jnp.int32
    assert jnp.array_equal(preds, jnp.argmax(logits, axis=1))

    # Non-aligned batch: exercises padding and the >=2-step grid (v7x split).
    x_big = jax.random.normal(k_x2, (300, 2), jnp.float32)
    logits_b = jax.block_until_ready(winenet_forward(x_big, params))
    assert logits_b.shape == (300, 3)
    assert jnp.allclose(logits_b, ref_forward(x_big, params),
                        atol=1e-4, rtol=1e-4)
    preds_b = jax.block_until_ready(winenet_inference(x_big, params))
    assert preds_b.shape == (300,)
    assert jnp.array_equal(preds_b, jnp.argmax(logits_b, axis=1))

    print("KERNEL_OK")
</pallas_src>

<mosaic_0001>
module attributes {stable_mosaic.version = 11 : i64} {
  func.func @winenet_fwd_kernel(%arg0: i32, %arg1: memref<2x128xf32, #tpu.memory_space<vmem>>, %arg2: memref<32x2xf32, #tpu.memory_space<vmem>>, %arg3: memref<32x1xf32, #tpu.memory_space<vmem>>, %arg4: memref<32x32xf32, #tpu.memory_space<vmem>>, %arg5: memref<32x1xf32, #tpu.memory_space<vmem>>, %arg6: memref<3x32xf32, #tpu.memory_space<vmem>>, %arg7: memref<3x1xf32, #tpu.memory_space<vmem>>, %arg8: memref<3x128xf32, #tpu.memory_space<vmem>>) attributes {dimension_semantics = [#tpu.dimension_semantics<parallel>], iteration_bounds = array<i64: 1>, scalar_prefetch = 0 : i64, scratch_operands = 0 : i64, tpu.core_type = #tpu.core_type<tc>, window_params = [{transform_indices = @transform_0, window_bounds = array<i64: 2, 128>}, {pipeline_mode = #tpu.pipeline_mode<synchronous>, transform_indices = @transform_1, window_bounds = array<i64: 32, 2>}, {pipeline_mode = #tpu.pipeline_mode<synchronous>, transform_indices = @transform_2, window_bounds = array<i64: 32, 1>}, {pipeline_mode = #tpu.pipeline_mode<synchronous>, transform_indices = @transform_3, window_bounds = array<i64: 32, 32>}, {pipeline_mode = #tpu.pipeline_mode<synchronous>, transform_indices = @transform_4, window_bounds = array<i64: 32, 1>}, {pipeline_mode = #tpu.pipeline_mode<synchronous>, transform_indices = @transform_5, window_bounds = array<i64: 3, 32>}, {pipeline_mode = #tpu.pipeline_mode<synchronous>, transform_indices = @transform_6, window_bounds = array<i64: 3, 1>}, {transform_indices = @transform_7, window_bounds = array<i64: 3, 128>}]} {
    %c0 = arith.constant 0 : index
    %c0_0 = arith.constant 0 : index
    %0 = vector.load %arg1[%c0, %c0_0] : memref<2x128xf32, #tpu.memory_space<vmem>>, vector<2x128xf32>
    %c0_1 = arith.constant 0 : index
    %c0_2 = arith.constant 0 : index
    %1 = vector.load %arg2[%c0_1, %c0_2] : memref<32x2xf32, #tpu.memory_space<vmem>>, vector<32x2xf32>
    %c0_3 = arith.constant 0 : index
    %c0_4 = arith.constant 0 : index
    %2 = vector.load %arg3[%c0_3, %c0_4] : memref<32x1xf32, #tpu.memory_space<vmem>>, vector<32x1xf32>
    %c0_5 = arith.constant 0 : index
    %c0_6 = arith.constant 0 : index
    %3 = vector.load %arg4[%c0_5, %c0_6] : memref<32x32xf32, #tpu.memory_space<vmem>>, vector<32x32xf32>
    %c0_7 = arith.constant 0 : index
    %c0_8 = arith.constant 0 : index
    %4 = vector.load %arg5[%c0_7, %c0_8] : memref<32x1xf32, #tpu.memory_space<vmem>>, vector<32x1xf32>
    %c0_9 = arith.constant 0 : index
    %c0_10 = arith.constant 0 : index
    %5 = vector.load %arg6[%c0_9, %c0_10] : memref<3x32xf32, #tpu.memory_space<vmem>>, vector<3x32xf32>
    %c0_11 = arith.constant 0 : index
    %c0_12 = arith.constant 0 : index
    %6 = vector.load %arg7[%c0_11, %c0_12] : memref<3x1xf32, #tpu.memory_space<vmem>>, vector<3x1xf32>
    %7 = vector.extract_strided_slice %1 {offsets = [0, 0], sizes = [32, 1], strides = [1, 1]} : vector<32x2xf32> to vector<32x1xf32>
    %8 = vector.extract_strided_slice %0 {offsets = [0, 0], sizes = [1, 128], strides = [1, 1]} : vector<2x128xf32> to vector<1x128xf32>
    %9 = vector.broadcast %7 : vector<32x1xf32> to vector<32x128xf32>
    %10 = vector.broadcast %8 : vector<1x128xf32> to vector<32x128xf32>
    %11 = arith.mulf %9, %10 : vector<32x128xf32>
    %12 = vector.extract_strided_slice %1 {offsets = [0, 1], sizes = [32, 1], strides = [1, 1]} : vector<32x2xf32> to vector<32x1xf32>
    %13 = vector.extract_strided_slice %0 {offsets = [1, 0], sizes = [1, 128], strides = [1, 1]} : vector<2x128xf32> to vector<1x128xf32>
    %14 = vector.broadcast %12 : vector<32x1xf32> to vector<32x128xf32>
    %15 = vector.broadcast %13 : vector<1x128xf32> to vector<32x128xf32>
    %16 = arith.mulf %14, %15 : vector<32x128xf32>
    %17 = arith.addf %11, %16 : vector<32x128xf32>
    %18 = vector.broadcast %2 : vector<32x1xf32> to vector<32x128xf32>
    %19 = arith.addf %17, %18 : vector<32x128xf32>
    %cst = arith.constant 5.000000e-01 : f32
    %20 = vector.broadcast %cst : f32 to vector<32x128xf32>
    %21 = arith.mulf %20, %19 : vector<32x128xf32>
    %22 = math.tanh %21 : vector<32x128xf32>
    %cst_13 = arith.constant 1.000000e+00 : f32
    %23 = vector.broadcast %cst_13 : f32 to vector<32x128xf32>
    %24 = arith.addf %22, %23 : vector<32x128xf32>
    %cst_14 = arith.constant 5.000000e-01 : f32
    %25 = vector.broadcast %cst_14 : f32 to vector<32x128xf32>
    %26 = arith.mulf %25, %24 : vector<32x128xf32>
    %cst_15 = arith.constant dense<0.000000e+00> : vector<32x128xf32>
    %27 = tpu.matmul %3, %26, %cst_15 {dimension_numbers = #tpu.dot_dimension_numbers<[1], [0], [0], [1], [0, 0, 1, 1], [], []>} : vector<32x32xf32>, vector<32x128xf32>, vector<32x128xf32> -> vector<32x128xf32>
    %28 = vector.broadcast %4 : vector<32x1xf32> to vector<32x128xf32>
    %29 = arith.addf %27, %28 : vector<32x128xf32>
    %cst_16 = arith.constant 5.000000e-01 : f32
    %30 = vector.broadcast %cst_16 : f32 to vector<32x128xf32>
    %31 = arith.mulf %30, %29 : vector<32x128xf32>
    %32 = math.tanh %31 : vector<32x128xf32>
    %cst_17 = arith.constant 1.000000e+00 : f32
    %33 = vector.broadcast %cst_17 : f32 to vector<32x128xf32>
    %34 = arith.addf %32, %33 : vector<32x128xf32>
    %cst_18 = arith.constant 5.000000e-01 : f32
    %35 = vector.broadcast %cst_18 : f32 to vector<32x128xf32>
    %36 = arith.mulf %35, %34 : vector<32x128xf32>
    %cst_19 = arith.constant dense<0.000000e+00> : vector<3x128xf32>
    %37 = tpu.matmul %5, %36, %cst_19 {dimension_numbers = #tpu.dot_dimension_numbers<[1], [0], [0], [1], [0, 0, 1, 1], [], []>} : vector<3x32xf32>, vector<32x128xf32>, vector<3x128xf32> -> vector<3x128xf32>
    %38 = vector.broadcast %6 : vector<3x1xf32> to vector<3x128xf32>
    %39 = arith.addf %37, %38 : vector<3x128xf32>
    %c0_20 = arith.constant 0 : index
    %c0_21 = arith.constant 0 : index
    %40 = vector.load %arg8[%c0_20, %c0_21] : memref<3x128xf32, #tpu.memory_space<vmem>>, vector<3x128xf32>
    tpu.vector_store %arg8[%c0_20, %c0_21], %39 {strides = array<i32>} : memref<3x128xf32, #tpu.memory_space<vmem>>, vector<3x128xf32>,
    return
  }
  func.func @transform_0(%arg0: i32) -> (i32, i32) {
    %c0_i32 = arith.constant 0 : i32
    %c0_i32_0 = arith.constant 0 : i32
    return %c0_i32, %arg0 : i32, i32
  }
  func.func @transform_1(%arg0: i32) -> (i32, i32) {
    %c0_i32 = arith.constant 0 : i32
    %c0_i32_0 = arith.constant 0 : i32
    %c0_i32_1 = arith.constant 0 : i32
    return %c0_i32, %c0_i32_0 : i32, i32
  }
  func.func @transform_2(%arg0: i32) -> (i32, i32) {
    %c0_i32 = arith.constant 0 : i32
    %c0_i32_0 = arith.constant 0 : i32
    %c0_i32_1 = arith.constant 0 : i32
    return %c0_i32, %c0_i32_0 : i32, i32
  }
  func.func @transform_3(%arg0: i32) -> (i32, i32) {
    %c0_i32 = arith.constant 0 : i32
    %c0_i32_0 = arith.constant 0 : i32
    %c0_i32_1 = arith.constant 0 : i32
    return %c0_i32, %c0_i32_0 : i32, i32
  }
  func.func @transform_4(%arg0: i32) -> (i32, i32) {
    %c0_i32 = arith.constant 0 : i32
    %c0_i32_0 = arith.constant 0 : i32
    %c0_i32_1 = arith.constant 0 : i32
    return %c0_i32, %c0_i32_0 : i32, i32
  }
  func.func @transform_5(%arg0: i32) -> (i32, i32) {
    %c0_i32 = arith.constant 0 : i32
    %c0_i32_0 = arith.constant 0 : i32
    %c0_i32_1 = arith.constant 0 : i32
    return %c0_i32, %c0_i32_0 : i32, i32
  }
  func.func @transform_6(%arg0: i32) -> (i32, i32) {
    %c0_i32 = arith.constant 0 : i32
    %c0_i32_0 = arith.constant 0 : i32
    %c0_i32_1 = arith.constant 0 : i32
    return %c0_i32, %c0_i32_0 : i32, i32
  }
  func.func @transform_7(%arg0: i32) -> (i32, i32) {
    %c0_i32 = arith.constant 0 : i32
    %c0_i32_0 = arith.constant 0 : i32
    return %c0_i32, %arg0 : i32, i32
  }
}

</mosaic_0001>

<bundles_post_ra>
// kernel: winenet_forward_t.1
= control target key start
LH: loop header
LB: loop body
LE: loop exit
PB: predicated region body
PF: predicated region fallthrough
CT: control target
= control target key end

     0   :  { %v326_v2 = vmov 0   ;;  %s434_s0 = inlined_call_operand.vmem [shape: f32[2,128], index: 0, kind: input, shape index: {}]   ;;  %s435_s1 = inlined_call_operand.vmem [shape: f32[32,2], index: 1, kind: input, shape index: {}]   ;;  %s436_s2 = inlined_call_operand.vmem [shape: f32[32,1], index: 2, kind: input, shape index: {}]   ;;  %s437_s3 = inlined_call_operand.vmem [shape: f32[32,32], index: 3, kind: input, shape index: {}]   ;;  %s438_s4 = inlined_call_operand.vmem [shape: f32[32,1], index: 4, kind: input, shape index: {}]   ;;  %s439_s5 = inlined_call_operand.vmem [shape: f32[3,32], index: 5, kind: input, shape index: {}]   ;;  %s440_s6 = inlined_call_operand.vmem [shape: f32[3,1], index: 6, kind: input, shape index: {}]   ;;  %s441_s7 = inlined_call_operand.hbm [shape: f32[3,128], index: 7, kind: output, shape index: {}]  }
   0x1   :  { %v31_v0 = vld [vmem:[%s435_s1 + $0x18] sm:$0xff]  ;;  %v30_v1 = vld [vmem:[%s435_s1 + $0x10] sm:$0xff]  ;;  %277 = vset.pattern.permute.xlu1 %v326_v2  ;;  %275 = vset.pattern.permute.xlu0 %v326_v2  ;;  %v29_v3 = vld [vmem:[%s435_s1 + $0x8] sm:$0xff] }
   0x2   :  { %63 = vperm.xlu0 %275, %v31_v0   ;;  %58 = vperm.xlu1 %277, %v30_v1  }
   0x3   :  { %279 = vset.pattern.permute.xlu2 %v326_v2 }
   0x4   :  { %12 = vsyncpa [#allocation3], 0  ;;  %53 = vperm.xlu2 %279, %v29_v3   ;;  %v327_v4 = vmov 1   ;;  %v28_v5 = vld [vmem:[%s435_s1] sm:$0xff]  ;;  %v35_v6 = vld [vmem:[%s436_s2 + $0x18] sm:$0xff]  ;;  %vm156_vm0 = vcmask 261120  }
   0x5   :  { %v34_v7 = vld [vmem:[%s436_s2 + $0x10] sm:$0xff]  ;;  %v32_v8 = vld [vmem:[%s436_s2] sm:$0xff]  ;;  %v33_v9 = vld [vmem:[%s436_s2 + $0x8] sm:$0xff]  ;;  %s328_s10 = smov [#allocation2]   ;;  %s250_s14 = sshll.u32 %s441_s7, 4  ;;  %s251_s14 = int_to_ptr.hbm [resolvable:$true] %s250_s14 }
   0x6   :  { %v43_v10 = vld [vmem:[%s438_s4 + $0x18] sm:$0xff]  ;;  %v45_v11 = vld [vmem:[%s440_s6] sm:$0x7]  ;;  %v42_v12 = vld [vmem:[%s438_s4 + $0x10] sm:$0xff]  ;;  %s248_s11 = sshll.u32 %s328_s10, 4  ;;  %s249_s11 = int_to_ptr.vmem [resolvable:$true] %s248_s11 }
   0x7   :  { %v41_v13 = vld [vmem:[%s438_s4 + $0x8] sm:$0xff]  ;;  %v40_v14 = vld [vmem:[%s438_s4] sm:$0xff] }
   0x8   :  { %v27_v19 = vld [vmem:[%s434_s0] sm:$0x3]  ;;  %v37_v63 = vld [vmem:[%s437_s3 + $0x8] sm:$0xff] }
   0x9   :  { %v87_v20 = vperm.slane %v27_v19, 1  ;;  %v66_v24 = vperm.slane %v27_v19, 0  ;;  %v36_v62 = vld [vmem:[%s437_s3] sm:$0xff] }
   0xa   :  { %276 = vset.pattern.permute.xlu0 %v327_v4  ;;  %278 = vset.pattern.permute.xlu1 %v327_v4 }
   0xb   :  { %84 = vperm.xlu0 %276, %v31_v0   ;;  %80 = vperm.xlu1 %278, %v30_v1   ;;  %v38_v0 = vld [vmem:[%s437_s3 + $0x10] sm:$0xff]  ;;  %v39_v1 = vld [vmem:[%s437_s3 + $0x18] sm:$0xff] }
   0xc   :  { %280 = vset.pattern.permute.xlu2 %v327_v4 }
   0xd   :  { %76 = vperm.xlu2 %280, %v29_v3  }
  0x13   :  { %281 = vset.pattern.permute.xlu1 %v326_v2  ;;  %72 = vperm.xlu0 %276, %v28_v5  }
  0x14   :  { %113 = vperm.xlu1 %281, %v35_v6  }
  0x15   :  { %282 = vset.pattern.permute.xlu2 %v326_v2 }
  0x16   :  { %48 = vperm.xlu2 %282, %v28_v5  }
  0x1b   :  { %283 = vset.pattern.permute.xlu0 %v326_v2 }
  0x1c   :  { %108 = vperm.xlu1 %281, %v34_v7   ;;  %98 = vperm.xlu0 %283, %v32_v8  }
  0x1e   :  { %103 = vperm.xlu2 %282, %v33_v9  }
  0x24   :  { %153 = vperm.xlu1 %281, %v43_v10   ;;  %216 = vperm.xlu0 %283, %v45_v11  }
  0x26   :  { %148 = vperm.xlu2 %282, %v42_v12  }
  0x2c   :  { %143 = vperm.xlu1 %281, %v41_v13  }
  0x2e   :  { %138 = vperm.xlu2 %282, %v40_v14  }
  0x5e   :  { %v54_v15 = vpop.permute.xlu2 %53 }
  0x5f   :  { %v68_v25 = vmul.f32 %v66_v24, %v54_v15 }
  0x67   :  { %v77_v16 = vpop.permute.xlu2 %76 }
  0x68   :  { %v89_v26 = vmul.f32 %v87_v20, %v77_v16 }
  0x6a   :  { %v93_v29 = vadd.f32 %v89_v26, %v68_v25 }
  0x70   :  { %v49_v23 = vpop.permute.xlu2 %48 }
  0x71   :  { %v67_v34 = vmul.f32 %v66_v24, %v49_v23 }
  0x74   :  { %v59_v17 = vpop.permute.xlu1 %58  ;;  %v64_v18 = vpop.permute.xlu0 %63 }
  0x75   :  { %v70_v28 = vmul.f32 %v66_v24, %v64_v18  ;;  %v69_v40 = vmul.f32 %v66_v24, %v59_v17 }
  0x78   :  { %v104_v35 = vpop.permute.xlu2 %103 }
  0x79   :  { %v117_v36 = vadd.f32 %v104_v35, %v93_v29 }
  0x7b   :  { %v121_v41 = vmul.f32 0.5, %v117_v36 }
  0x7d   :  { %v85_v21 = vpop.permute.xlu0 %84  ;;  %v81_v22 = vpop.permute.xlu1 %80 }
  0x7e   :  { %v91_v27 = vmul.f32 %v87_v20, %v85_v21  ;;  %v90_v37 = vmul.f32 %v87_v20, %v81_v22 }
  0x80   :  { %v95_v31 = vadd.f32 %v91_v27, %v70_v28  ;;  %v94_v42 = vadd.f32 %v90_v37, %v69_v40  ;;  %v149_v3 = vpop.permute.xlu2 %148 }
  0x85   :  { %v73_v30 = vpop.permute.xlu0 %72 }
  0x86   :  { %v114_v32 = vpop.permute.xlu1 %113  ;;  %v88_v38 = vmul.f32 %v87_v20, %v73_v30  ;;  %v44_v30 = vld [vmem:[%s439_s5] sm:$0x7] }
  0x87   :  { %v119_v33 = vadd.f32 %v114_v32, %v95_v31 }
  0x88   :  { %v92_v43 = vadd.f32 %v88_v38, %v67_v34  ;;  %v139_v10 = vpop.permute.xlu2 %138 }
  0x89   :  { %v123_v39 = vmul.f32 0.5, %v119_v33 }
  0x8b   :  { %284 = vtanh.f32 %v123_v39 }
  0x8c   :  { %286 = vtanh.f32 %v121_v41 }
  0x8e   :  { %v109_v44 = vpop.permute.xlu1 %108  ;;  %v99_v45 = vpop.permute.xlu0 %98 }
  0x8f   :  { %v118_v46 = vadd.f32 %v109_v44, %v94_v42  ;;  %v116_v47 = vadd.f32 %v99_v45, %v92_v43 }
  0x91   :  { %v285_v48 = vpop.eup %284  ;;  %v122_v49 = vmul.f32 0.5, %v118_v46  ;;  %v120_v50 = vmul.f32 0.5, %v116_v47 }
  0x92   :  { %v131_v51 = vadd.f32 1.0, %v285_v48  ;;  %v287_v53 = vpop.eup %286 }
  0x93   :  { %288 = vtanh.f32 %v122_v49  ;;  %v129_v56 = vadd.f32 1.0, %v287_v53 }
  0x94   :  { %v135_v52 = vmul.f32 0.5, %v131_v51  ;;  %290 = vtanh.f32 %v120_v50 }
  0x95   :  { %v133_v60 = vmul.f32 0.5, %v129_v56 }
  0x96   :  { %181 = vmatpush.msra.mxu0 %v135_v52  ;;  %264 = vmatpush.msra.mxu2 %v135_v52  ;;  %v154_v2 = vpop.permute.xlu1 %153  ;;  %v217_v31 = vpop.permute.xlu0 %216 }
  0x97   :  { %265 = vmatpush.msra.mxu3 %v135_v52 }
  0x99   :  { %v289_v54 = vpop.eup %288 }
  0x9a   :  { %v291_v55 = vpop.eup %290  ;;  %v130_v57 = vadd.f32 1.0, %v289_v54 }
  0x9b   :  { %v128_v59 = vadd.f32 1.0, %v291_v55 }
  0x9c   :  { %v134_v58 = vmul.f32 0.5, %v130_v57 }
  0x9d   :  { %v132_v61 = vmul.f32 0.5, %v128_v59 }
  0x9e   :  { %182 = vmatpush.msra.mxu0 %v134_v58  ;;  %266 = vmatpush.msra.mxu2 %v134_v58  ;;  %v144_v6 = vpop.permute.xlu1 %143 }
  0x9f   :  { %267 = vmatpush.msra.mxu3 %v134_v58 }
  0xa0   :  { %183 = vmatpush.msra.mxu0 %v133_v60  ;;  %268 = vmatpush.msra.mxu2 %v133_v60 }
  0xa1   :  { %269 = vmatpush.msra.mxu3 %v133_v60 }
  0xa2   :  { %184 = vmatpush.msra.mxu0 %v132_v61  ;;  %270 = vmatpush.msra.mxu2 %v132_v61 }
  0xa3   :  { %271 = vmatpush.msra.mxu3 %v132_v61  ;;  %259 = vmatmul.msk.f32.vlgmr.msra.gmra.mxu0 %vm156_vm0, %v36_v62 }
  0xa4   :  { %260 = vmatmul.msk.f32.vlgmr.msra.gmra.mxu2 %vm156_vm0, %v37_v63  ;;  %261 = vmatmul.msk.f32.vlgmr.msra.gmra.mxu3 %vm156_vm0, %v38_v0 }
  0xac   :  { %262 = vmatmul.msk.f32.gmra.mxu3 %vm156_vm0, %v39_v1 }
 0x120   :  { %v186_v8 = vpop.f32.mrf.mxu0 }
 0x121   :  { %v187_v11 = vadd.f32 %v186_v8, %v139_v10 }
 0x123   :  { %v198_v16 = vmul.f32 0.5, %v187_v11 }
 0x127   :  { %v192_v4 = vpop.f32.mrf.mxu3  ;;  %v189_v5 = vpop.f32.mrf.mxu2 }
 0x128   :  { %v193_v7 = vadd.f32 %v192_v4, %v149_v3  ;;  %v190_v9 = vadd.f32 %v189_v5, %v144_v6 }
 0x12a   :  { %v200_v12 = vmul.f32 0.5, %v193_v7  ;;  %v199_v13 = vmul.f32 0.5, %v190_v9 }
 0x12c   :  { %292 = vtanh.f32 %v200_v12 }
 0x12d   :  { %294 = vtanh.f32 %v199_v13 }
 0x12f   :  { %v195_v14 = vpop.f32.mrf.mxu3 }
 0x130   :  { %v196_v15 = vadd.f32 %v195_v14, %v154_v2 }
 0x132   :  { %v201_v17 = vmul.f32 0.5, %v196_v15  ;;  %v293_v18 = vpop.eup %292 }
 0x133   :  { %v295_v19 = vpop.eup %294  ;;  %v208_v22 = vadd.f32 1.0, %v293_v18 }
 0x134   :  { %296 = vtanh.f32 %v201_v17  ;;  %v207_v25 = vadd.f32 1.0, %v295_v19 }
 0x135   :  { %298 = vtanh.f32 %v198_v16  ;;  %v212_v26 = vmul.f32 0.5, %v208_v22 }
 0x136   :  { %v211_v28 = vmul.f32 0.5, %v207_v25 }
 0x13a   :  { %v297_v20 = vpop.eup %296 }
 0x13b   :  { %v209_v21 = vadd.f32 1.0, %v297_v20  ;;  %v299_v23 = vpop.eup %298 }
 0x13c   :  { %v206_v27 = vadd.f32 1.0, %v299_v23 }
 0x13d   :  { %v213_v24 = vmul.f32 0.5, %v209_v21 }
 0x13e   :  { %v210_v29 = vmul.f32 0.5, %v206_v27 }
 0x13f   :  { %234 = vmatpush.msra.mxu1 %v213_v24 }
 0x141   :  { %235 = vmatpush.msra.mxu1 %v212_v26 }
 0x143   :  { %236 = vmatpush.msra.mxu1 %v211_v28 }
 0x145   :  { %237 = vmatpush.msra.mxu1 %v210_v29 }
 0x146   :  { %263 = vmatmul.msk.f32.vlgmr.msra.gmra.mxu1 %vm156_vm0, %v44_v30 }
 0x1c3   :  { %v239_v32 = vpop.f32.mrf.mxu1 }
 0x1c4   :  { %v240_v33 = vadd.f32 %v239_v32, %v217_v31 }
 0x1c6   :  { %242 = vst [vmem:[#allocation2] sm:$0x7] %v240_v33 }
 0x1c7   :  { %253 = dma.vmem_to_hbm [thread:$0]  %s249_s11, 64, %s251_s14, [#allocation3]  }
 0x1c8   :  { %324 = dma.done.wait [#allocation3], 64  }
 0x1c9   :  { %325 = vsyncadd [#allocation3], 4294967232 }
 0x1ca   :  { %258 = vsyncpa [#allocation3], 1 }

</bundles_post_ra>
